<compile_context>
chip_gen: v6e
topology: v6e:2x2x1
jax: 0.10.0
libtpu: 0.0.40
codegen_flags: <defaults>
</compile_context>

<pallas_src>
import functools
import itertools
import math
import random

import numpy as np

import jax
import jax.numpy as jnp
from jax.experimental import pallas as pl
from jax.experimental.pallas import tpu as pltpu


# Constants hard-coded inside the PyTorch forward().
F_X = 804.18848168
F_Y = 804.18848168
C_X = 128.0
C_Y = 128.0
AXIS = (0.0, 0.0, 1.0)          # torch.tensor([0., 0., 1.])  (folded at trace time)
TEMPERATURE = 10.0              # SpatialSoftArgmax2d(temperature=10)


def _round_up(x, m):
    return ((x + m - 1) // m) * m


# ----------------------------------------------------------------------------
# Kernel 1: SpatialSoftArgmax2d (normalized_coordinates=False)
# ----------------------------------------------------------------------------
def _soft_argmax_kernel(hm_ref, coords_ref, out_ref, *, temperature):
    z = hm_ref[...] * temperature                        # (tile, HW)
    z_max = jnp.max(z, axis=-1, keepdims=True)           # stability (one XLU reduce)
    e = jnp.exp(z - z_max)
    # coords columns: [x, y, 1, 0, 0, 0, 0, 0]  -> one MXU matmul replaces the
    # three cross-lane sum reductions.  bf16 operands, f32 accumulation.
    acc = jnp.dot(e.astype(jnp.bfloat16), coords_ref[...],
                  preferred_element_type=jnp.float32)     # (tile, 8)
    inv_s = pl.reciprocal(acc[:, 2:3])                    # EXACT softmax denom
    out_ref[...] = acc * inv_s                            # narrow 8-lane output


def spatial_soft_argmax2d(heatmaps, temperature=TEMPERATURE):
    """Kornia-style SpatialSoftArgmax2d with pixel coordinates; returns (B, N, 2)."""
    B, N, H, W = heatmaps.shape
    hw = H * W
    bn = B * N

    # Row tile derived from HW: the double-buffered (tile, hw) f32 input is the
    # dominant VMEM consumer (2*tile*hw*4 B); budget ~16 MiB of it so it fits
    # v7x's 32 MiB default scoped VMEM with headroom for coords + output.
    # TODO(synk): for extreme HW (>~500k pixels) an explicit HW-reduction grid
    # axis with an accumulator would be needed; not implemented here.
    budget = 16 * 1024 * 1024
    tile = max(8, min(512, (budget // (2 * hw * 4)) // 8 * 8))
    tile = min(tile, _round_up(bn, 8))                   # don't over-pad tiny B*N
    bn_pad = _round_up(bn, tile)

    hm = heatmaps.reshape(bn, hw).astype(jnp.float32)
    if bn_pad != bn:
        hm = jnp.pad(hm, ((0, bn_pad - bn), (0, 0)))

    coords = np.zeros((hw, 8), np.float32)
    coords[:, 0] = np.tile(np.arange(W, dtype=np.float32), H)      # x = column index
    coords[:, 1] = np.repeat(np.arange(H, dtype=np.float32), W)    # y = row index
    coords[:, 2] = 1.0
    coords = jnp.asarray(coords, dtype=jnp.bfloat16)               # <=255 exact in bf16

    out = pl.pallas_call(
        functools.partial(_soft_argmax_kernel, temperature=temperature),
        out_shape=jax.ShapeDtypeStruct((bn_pad, 8), jnp.float32),
        grid=(bn_pad // tile,),
        in_specs=[
            pl.BlockSpec((tile, hw), lambda i: (i, 0)),
            pl.BlockSpec((hw, 8), lambda i: (0, 0)),
        ],
        out_specs=pl.BlockSpec((tile, 8), lambda i: (i, 0)),
        compiler_params=pltpu.CompilerParams(dimension_semantics=("parallel",)),
    )(hm, coords)
    return out[:bn, :2].reshape(B, N, 2)


# ----------------------------------------------------------------------------
# Kernel 2: TwoPointPoseCore + AddPoseSolution + in-kernel inlier count
#   comp_ref : (12, TILE_R, 128)  channels [p1x,p1y,p1z, p2x,p2y,p2z,
#                                           b1x,b1y,b1z, b2x,b2y,b2z]
#   lm_ref   : SMEM (M, 5)        [lm_Rxy_x, lm_Rxy_y, lm_Rxy_z, ref_u, ref_v]
#   out_ref  : (8, TILE_R, 128)   [cos, sin, t0, t1, t2, disc, myroot, inliers]
# ----------------------------------------------------------------------------
def _two_point_pose_kernel(comp_ref, lm_ref, out_ref, *, thr_sq, n_landmarks):
    # AXIS = (0, 0, 1) constant-folded:
    #   axis_dot(v) == v_z
    #   basis_vector_2 = cross(axis, nmd)      = (-nmd_y, nmd_x, 0)
    #   basis_vector_1 = cross(bv2, norm_axis) = ( nmd_x, nmd_y, 0)
    p1_x, p1_y, p1_z = comp_ref[0], comp_ref[1], comp_ref[2]     # (TILE_R, 128) each
    p2_x, p2_y, p2_z = comp_ref[3], comp_ref[4], comp_ref[5]
    b1_x, b1_y, b1_z = comp_ref[6], comp_ref[7], comp_ref[8]
    b2_x, b2_y, b2_z = comp_ref[9], comp_ref[10], comp_ref[11]

    md_x = p1_x - p2_x
    md_y = p1_y - p2_y
    md_z = p1_z - p2_z

    # --- TwoPointPoseCore ---
    inv_r1z = pl.reciprocal(b1_z)                       # hoisted; reused for m and n
    m = md_z * inv_r1z
    n = b2_z * inv_r1z
    ray_dp = b1_x * b2_x + b1_y * b2_y + b1_z * b2_z
    a = n * (n - 2.0 * ray_dp) + 1.0
    b = 2.0 * m * (n - ray_dp)
    md_sq = md_x * md_x + md_y * md_y + md_z * md_z
    c = m * m - md_sq
    disc = b * b - 4.0 * a * c
    # PyTorch expression reproduced literally (its precedence divides only sqrt(disc)).
    myroot = -b + jnp.sqrt(disc) * pl.reciprocal(2.0 * a)
    ray_distance = m + n * myroot

    # --- AddPoseSolution ---
    pim1_x = ray_distance * b1_x
    pim1_y = ray_distance * b1_y
    pim1_z = ray_distance * b1_z
    id_x = pim1_x - myroot * b2_x                       # image_points_diff (z unused:
    id_y = pim1_y - myroot * b2_y                       #  bv1_z = bv2_z = 0)

    inv_mdn = jax.lax.rsqrt(md_sq)                      # rsqrt: one EUP op, not two
    nmd_x = md_x * inv_mdn
    nmd_y = md_y * inv_mdn
    dp_1 = nmd_x * id_x + nmd_y * id_y                  # bv1 = ( nmd_x, nmd_y, 0)
    dp_2 = nmd_x * id_y - nmd_y * id_x                  # bv2 = (-nmd_y, nmd_x, 0)
    # sin/cos of atan2(dp_2, dp_1) without the atan2 round trip (angle on host).
    inv_hyp = jax.lax.rsqrt(dp_1 * dp_1 + dp_2 * dp_2)
    cos_t = dp_1 * inv_hyp
    sin_t = dp_2 * inv_hyp

    t0 = pim1_x - (cos_t * p1_x - sin_t * p1_y)         # t = p_img_1 - R @ model_point_1
    t1 = pim1_y - (sin_t * p1_x + cos_t * p1_y)
    t2 = pim1_z - p1_z

    out_ref[0] = cos_t                                  # single merged output block;
    out_ref[1] = sin_t                                  # R's constant rows rebuilt on host
    out_ref[2] = t0
    out_ref[3] = t1
    out_ref[4] = t2
    out_ref[5] = disc
    out_ref[6] = myroot

    # --- in-kernel inlier count over the M landmarks (replaces (M, C) diff) ---
    # Landmarks live in SMEM; each iteration is a handful of VPU ops on full
    # (TILE_R, 128) blocks.  Python-unrolled: M is small (tens).
    count = jnp.zeros_like(cos_t)
    for mi in range(n_landmarks):
        lx = lm_ref[mi, 0]
        ly = lm_ref[mi, 1]
        lz = lm_ref[mi, 2]
        ru = lm_ref[mi, 3]
        rv = lm_ref[mi, 4]
        rt_x = lx * cos_t - ly * sin_t + t0
        rt_y = lx * sin_t + ly * cos_t + t1
        rt_z = lz + t2
        inv_z = pl.reciprocal(rt_z)                     # exact: decisions near threshold
        du = (F_X * rt_x + C_X * rt_z) * inv_z - ru
        dv = (F_Y * rt_y + C_Y * rt_z) * inv_z - rv
        count = count + jnp.where(du * du + dv * dv < thr_sq, 1.0, 0.0)
    out_ref[7] = count


def two_point_pose_pallas(p1, p2, b1, b2, lm3_rxy, lm2d_ref, threshold):
    """Returns an (8, C) float32 array with rows
       [cos, sin, t0, t1, t2, disc, myroot, inlier_count]."""
    C = int(p1.shape[0])
    M = int(lm3_rxy.shape[0])

    # Tile-first sizing: tile_c is a multiple of 8*128 so every per-combination
    # temporary is a whole (8,128)+ vreg, then C is padded UP to a multiple of
    # it.  Per-step working set ~= 2 x (12 in + 8 out) x tile_c x 4 B plus ~30
    # live temporaries -> well under 1 MiB even at tile_c = 2048, i.e. far
    # below v7x's 64 MiB VMEM (and v5e/v6e's 128 MiB); the tile only needs to
    # amortize the ~0.35 us/step overhead.  n_steps >= 2 so the "parallel"
    # combo axis actually splits across v7x's two TensorCores.
    tile_c = 2048 if C > 4096 else 1024
    n_steps = max(2, pl.cdiv(C, tile_c))
    c_pad = n_steps * tile_c
    tile_r = tile_c // 128
    c_rows = c_pad // 128

    comp = np.concatenate([np.asarray(p1, np.float32).T,
                           np.asarray(p2, np.float32).T,
                           np.asarray(b1, np.float32).T,
                           np.asarray(b2, np.float32).T], axis=0)      # (12, C)
    if c_pad != C:
        comp = np.pad(comp, ((0, 0), (0, c_pad - C)), mode='edge')     # well-conditioned pad
    comp = comp.reshape(12, c_rows, 128)        # combo c -> (row c//128, lane c%128)

    lm = np.concatenate([np.asarray(lm3_rxy, np.float32),
                         np.asarray(lm2d_ref, np.float32)], axis=1)    # (M, 5)

    # VMEM limit from the actual working set (generous headroom, << 64 MiB v7x).
    vmem_bytes = max(16 * 1024 * 1024, 16 * (12 + 8) * tile_c * 4)

    out = pl.pallas_call(
        functools.partial(_two_point_pose_kernel,
                          thr_sq=float(threshold) ** 2, n_landmarks=M),
        out_shape=jax.ShapeDtypeStruct((8, c_rows, 128), jnp.float32),
        grid=(n_steps,),
        in_specs=[
            pl.BlockSpec((12, tile_r, 128), lambda i: (0, i, 0)),
            pl.BlockSpec(memory_space=pltpu.MemorySpace.SMEM),
        ],
        out_specs=pl.BlockSpec((8, tile_r, 128), lambda i: (0, i, 0)),
        compiler_params=pltpu.CompilerParams(
            dimension_semantics=("parallel",),
            vmem_limit_bytes=vmem_bytes),
    )(jnp.asarray(comp), jnp.asarray(lm))
    return out.reshape(8, c_pad)[:, :C]


# ----------------------------------------------------------------------------
# Forward pass (host glue mirrors the PyTorch control flow)
# ----------------------------------------------------------------------------
def sweeney_2p_ransac_forward(pred_heatmaps, target_landmarks, transformation_gt,
                              training=False, times=10, threshold=4.0,
                              softmax_w=1.0, softmax_b=0.0, rng_seed=0):
    # Parameters are declared (deterministically initialized) but, as in the
    # PyTorch module, only printed — they do not enter the computation.
    print('softmax_w, softmax_b:', softmax_w, softmax_b)

    landmarks_2d_all = spatial_soft_argmax2d(pred_heatmaps)         # Pallas kernel 1

    # TODO(synk): boolean-mask selection, pair filtering, and the random RANSAC
    # index loop are data-dependent / dynamically shaped; they stay on host.
    tl = np.asarray(target_landmarks, np.float32)
    lm2d_all = np.asarray(landmarks_2d_all, np.float32)
    mask = tl[:, :, 0].astype(bool)
    landmarks_2d = lm2d_all[mask][None]        # (1, M, 2)
    landmarks_3d = tl[:, :, 3:][mask][None]    # (1, M, 3)
    landmarks_2d_gt = tl[:, :, 1:3][mask][None]
    M = landmarks_2d.shape[1]

    combos = np.array(list(itertools.combinations(range(M), 2)), dtype=np.int64)
    if combos.size:
        epsilon = 2.0
        d2 = np.linalg.norm(landmarks_2d[0, combos[:, 0]] -
                            landmarks_2d[0, combos[:, 1]], axis=-1)
        combos = combos[d2 > epsilon]
    if combos.size == 0:
        print('No enough inliers!')
        return []

    if training:
        # scipy Rotation.as_euler('xyz') (extrinsic x-y-z) equivalent, done by hand.
        Rgt = np.asarray(transformation_gt, np.float64)[0][:3, :3]
        ax = math.atan2(Rgt[2, 1], Rgt[2, 2])
        ay = math.asin(float(np.clip(-Rgt[2, 0], -1.0, 1.0)))
    else:
        ax = math.pi / 2
        ay = 0.0

    Rx = np.array([[1, 0, 0],
                   [0, math.cos(ax), -math.sin(ax)],
                   [0, math.sin(ax), math.cos(ax)]], np.float32)
    Ry = np.array([[math.cos(ay), 0, math.sin(ay)],
                   [0, 1, 0],
                   [-math.sin(ay), 0, math.cos(ay)]], np.float32)
    Rxy = Ry @ Rx

    lm3d_1 = landmarks_3d[0, combos[:, 0]]
    lm3d_2 = landmarks_3d[0, combos[:, 1]]
    lm2d_1 = landmarks_2d[0, combos[:, 0]]
    lm2d_2 = landmarks_2d[0, combos[:, 1]]

    point_3d_1 = lm3d_1 @ Rxy.T                 # == (Ry @ Rx @ X^T)^T
    point_3d_2 = lm3d_2 @ Rxy.T

    aug_ones = np.ones((lm2d_1.shape[0], 1), np.float32)
    point_2d_1 = np.concatenate([lm2d_1, aug_ones], axis=-1)
    point_2d_2 = np.concatenate([lm2d_2, aug_ones], axis=-1)
    intrinsic = np.array([[F_X, 0.0, C_X], [0.0, F_Y, C_Y], [0.0, 0.0, 1.0]], np.float32)
    k_inv = np.linalg.inv(intrinsic)
    bearing_1 = point_2d_1 @ k_inv.T
    bearing_2 = point_2d_2 @ k_inv.T
    bearing_1 = bearing_1 / np.linalg.norm(bearing_1, axis=-1, keepdims=True)
    bearing_2 = bearing_2 / np.linalg.norm(bearing_2, axis=-1, keepdims=True)

    landmarks_3d_Rxy = landmarks_3d[0] @ Rxy.T  # (M, 3)
    lm2d_ref = landmarks_2d_gt[0] if training else landmarks_2d[0]

    out8 = np.asarray(two_point_pose_pallas(    # Pallas kernel 2, single (8, C) pull
        point_3d_1, point_3d_2, bearing_1, bearing_2,
        landmarks_3d_Rxy, lm2d_ref, threshold))
    cos_t, sin_t, t0, t1, t2, disc, myroot, inlier_counts = out8

    # Ordering matches the PyTorch reference: disc<0 early-return happens BEFORE
    # any myroot NaN inspection (padded/NaN lanes were already sliced off).
    if np.any(disc < 0):
        print('Not satisfying Delta-Condition!')
        return []
    if np.any(np.isnan(myroot)) or np.any(np.isinf(myroot)):
        raise NotImplementedError()
    if np.any(np.isnan(cos_t)) or np.any(np.isnan(sin_t)):      # == isnan(R.mean()) check
        raise NotImplementedError()

    inliers = inlier_counts.astype(np.int64)    # exact small integers held in f32

    rnd = random.Random(rng_seed)               # deterministic stand-in for random.randint
    inlier_num_max = -1
    Rz_ret = t_ret = az_ret = None
    for _ in range(times):
        random_index = rnd.randint(0, combos.shape[0] - 1)
        inlier_num = int(inliers[random_index])
        if inlier_num > inlier_num_max:
            inlier_num_max = inlier_num
            c = float(cos_t[random_index])
            s = float(sin_t[random_index])
            Rz_ret = np.array([[c, -s, 0.0],
                               [s, c, 0.0],
                               [0.0, 0.0, 1.0]], np.float32)
            t_ret = np.array([[t0[random_index], t1[random_index], t2[random_index]]],
                             np.float32)
            az_ret = np.float32(math.atan2(s, c))   # == atan2(dp_2, dp_1)
    return jnp.asarray(Rz_ret), jnp.asarray(t_ret), jnp.asarray(az_ret)


# ----------------------------------------------------------------------------
# Main: deterministic synthetic data, geometrically consistent with the solver
# ----------------------------------------------------------------------------
if __name__ == "__main__":
    key = jax.random.PRNGKey(0)
    k_noise, k_depth = jax.random.split(key)

    B, N, H, W = 1, 16, 16, 16

    # 16 distinct heat-map peaks on a 4x4 pixel grid (pairwise distance >= 4 > epsilon).
    coords = np.array([2.0, 6.0, 10.0, 14.0], np.float64)
    uu, vv = np.meshgrid(coords, coords, indexing='xy')
    peaks = np.stack([uu.ravel(), vv.ravel()], axis=-1)             # (N, 2) as (x, y)

    yy, xx = np.meshgrid(np.arange(H, dtype=np.float64),
                         np.arange(W, dtype=np.float64), indexing='ij')
    hm = np.zeros((B, N, H, W), np.float32)
    for j in range(N):
        px, py = peaks[j]
        hm[0, j] = (6.0 * np.exp(-(((xx - px) ** 2 + (yy - py) ** 2) /
                                   (2.0 * 0.7 ** 2)))).astype(np.float32)
    noise = 0.02 * jax.random.normal(k_noise, (B, N, H, W), dtype=jnp.float32)
    pred_heatmaps = jnp.asarray(hm) + noise

    # Geometrically consistent 3-D landmarks: a camera-space point along every
    # pixel ray, mapped back to model space through (Rz_true, t_true) and the
    # eval-mode pre-rotation Rx(pi/2), Ry(0).  This keeps the 2-point quadratic
    # discriminant non-negative so the forward does not early-exit.
    intrinsic = np.array([[F_X, 0.0, C_X], [0.0, F_Y, C_Y], [0.0, 0.0, 1.0]], np.float64)
    k_inv = np.linalg.inv(intrinsic)
    depths = (5.0 + 0.002 * np.arange(N) +
              0.002 * np.asarray(jax.random.uniform(k_depth, (N,)), np.float64))
    pix_h = np.concatenate([peaks, np.ones((N, 1))], axis=-1)       # (N, 3)
    cam_pts = (pix_h @ k_inv.T) * depths[:, None]                   # (N, 3)

    theta = 0.3
    Rz_true = np.array([[math.cos(theta), -math.sin(theta), 0.0],
                        [math.sin(theta), math.cos(theta), 0.0],
                        [0.0, 0.0, 1.0]])
    t_true = np.array([0.2, -0.1, 0.5])
    ax0 = math.pi / 2
    Rx0 = np.array([[1, 0, 0],
                    [0, math.cos(ax0), -math.sin(ax0)],
                    [0, math.sin(ax0), math.cos(ax0)]])
    Ry0 = np.eye(3)
    Rxy0 = Ry0 @ Rx0
    model_pts = (np.linalg.inv(Rxy0) @ (Rz_true.T @ (cam_pts - t_true).T)).T   # (N, 3)

    target_landmarks = np.zeros((B, N, 6), np.float32)
    target_landmarks[0, :, 0] = 1.0                 # mask
    target_landmarks[0, :, 1:3] = peaks             # 2-D ground truth (x, y)
    target_landmarks[0, :, 3:] = model_pts          # 3-D landmarks

    T_gt = np.eye(4, dtype=np.float32)
    T_gt[:3, :3] = (Rz_true @ Rxy0).astype(np.float32)
    T_gt[:3, 3] = t_true.astype(np.float32)
    transformation_gt = jnp.asarray(T_gt)[None]

    out = sweeney_2p_ransac_forward(pred_heatmaps,
                                    jnp.asarray(target_landmarks),
                                    transformation_gt,
                                    training=False)
    if not isinstance(out, tuple):
        raise RuntimeError("forward returned an empty result")
    Rz_ret, t_ret, az_ret = out
    jax.block_until_ready((Rz_ret, t_ret, az_ret))
    print("KERNEL_OK")
</pallas_src>

<mosaic_0001>
module attributes {stable_mosaic.version = 11 : i64} {
  func.func @_soft_argmax_kernel(%arg0: i32, %arg1: memref<16x256xf32, #tpu.memory_space<vmem>>, %arg2: memref<256x8xbf16, #tpu.memory_space<vmem>>, %arg3: memref<16x8xf32, #tpu.memory_space<vmem>>) attributes {dimension_semantics = [#tpu.dimension_semantics<parallel>], iteration_bounds = array<i64: 1>, scalar_prefetch = 0 : i64, scratch_operands = 0 : i64, tpu.core_type = #tpu.core_type<tc>, window_params = [{transform_indices = @transform_0, window_bounds = array<i64: 16, 256>}, {pipeline_mode = #tpu.pipeline_mode<synchronous>, transform_indices = @transform_1, window_bounds = array<i64: 256, 8>}, {transform_indices = @transform_2, window_bounds = array<i64: 16, 8>}]} {
    %c0 = arith.constant 0 : index
    %c0_0 = arith.constant 0 : index
    %0 = vector.load %arg1[%c0, %c0_0] : memref<16x256xf32, #tpu.memory_space<vmem>>, vector<16x256xf32>
    %cst = arith.constant 1.000000e+01 : f32
    %1 = vector.broadcast %cst : f32 to vector<16x256xf32>
    %2 = arith.mulf %0, %1 : vector<16x256xf32>
    %cst_1 = arith.constant dense<0xFF800000> : vector<16xf32>
    %3 = vector.multi_reduction <maximumf>, %2, %cst_1 [1] : vector<16x256xf32> to vector<16xf32>
    %4 = vector.shape_cast %3 : vector<16xf32> to vector<16x1xf32>
    %5 = vector.broadcast %4 : vector<16x1xf32> to vector<16x256xf32>
    %6 = arith.subf %2, %5 : vector<16x256xf32>
    %7 = math.exp %6 : vector<16x256xf32>
    %8 = arith.truncf %7 : vector<16x256xf32> to vector<16x256xbf16>
    %c0_2 = arith.constant 0 : index
    %c0_3 = arith.constant 0 : index
    %9 = vector.load %arg2[%c0_2, %c0_3] : memref<256x8xbf16, #tpu.memory_space<vmem>>, vector<256x8xbf16>
    %cst_4 = arith.constant dense<0.000000e+00> : vector<16x8xf32>
    %10 = tpu.matmul %8, %9, %cst_4 {dimension_numbers = #tpu.dot_dimension_numbers<[1], [0], [0], [1], [0, 0, 1, 1], [], []>} : vector<16x256xbf16>, vector<256x8xbf16>, vector<16x8xf32> -> vector<16x8xf32>
    %11 = vector.extract_strided_slice %10 {offsets = [0, 2], sizes = [16, 1], strides = [1, 1]} : vector<16x8xf32> to vector<16x1xf32>
    %12 = tpu.reciprocal %11 : vector<16x1xf32> -> vector<16x1xf32>
    %13 = vector.broadcast %12 : vector<16x1xf32> to vector<16x8xf32>
    %14 = arith.mulf %10, %13 : vector<16x8xf32>
    %c0_5 = arith.constant 0 : index
    %c0_6 = arith.constant 0 : index
    %15 = vector.load %arg3[%c0_5, %c0_6] : memref<16x8xf32, #tpu.memory_space<vmem>>, vector<16x8xf32>
    tpu.vector_store %arg3[%c0_5, %c0_6], %14 {strides = array<i32>} : memref<16x8xf32, #tpu.memory_space<vmem>>, vector<16x8xf32>,
    return
  }
  func.func @transform_0(%arg0: i32) -> (i32, i32) {
    %c0_i32 = arith.constant 0 : i32
    %c0_i32_0 = arith.constant 0 : i32
    return %arg0, %c0_i32 : i32, i32
  }
  func.func @transform_1(%arg0: i32) -> (i32, i32) {
    %c0_i32 = arith.constant 0 : i32
    %c0_i32_0 = arith.constant 0 : i32
    %c0_i32_1 = arith.constant 0 : i32
    return %c0_i32, %c0_i32_0 : i32, i32
  }
  func.func @transform_2(%arg0: i32) -> (i32, i32) {
    %c0_i32 = arith.constant 0 : i32
    %c0_i32_0 = arith.constant 0 : i32
    return %arg0, %c0_i32 : i32, i32
  }
}

</mosaic_0001>

<bundles_post_ra>
// kernel: tpu_custom_call.1
= control target key start
LH: loop header
LB: loop body
LE: loop exit
PB: predicated region body
PF: predicated region fallthrough
CT: control target
= control target key end

     0   :  { %v299_v42 = vmov 2   ;;  %vm223_vm0 = vcmask 64512   ;;  %s381_s0 = inlined_call_operand.vmem [shape: f32[16,256], index: 0, kind: input, shape index: {}]   ;;  %s382_s1 = inlined_call_operand.vmem [shape: bf16[256,8], index: 1, kind: input, shape index: {}]   ;;  %s383_s2 = inlined_call_operand.vmem [shape: f32[16,8], index: 2, kind: output, shape index: {}]  }
   0x1   :  { %v12_v0 = vld [vmem:[%s381_s0] sm:$0xff]  ;;  %v13_v1 = vld [vmem:[%s381_s0 + $0x8] sm:$0xff]  ;;  %v14_v2 = vld [vmem:[%s381_s0 + $0x10] sm:$0xff]  ;;  %269 = vset.pattern.permute.xlu1 %v299_v42  ;;  %270 = vset.pattern.permute.xlu0 %v299_v42 }
   0x2   :  { %v16_v3 = vmul.f32 10.0, %v12_v0  ;;  %v17_v4 = vmul.f32 10.0, %v13_v1  ;;  %v15_v5 = vld [vmem:[%s381_s0 + $0x18] sm:$0xff]  ;;  %v18_v6 = vmul.f32 10.0, %v14_v2  ;;  %v273_v11 = vld [vmem:[%s382_s1 + $0x70] sm:$0xff]   ;;  %v275_v14 = vld [vmem:[%s382_s1 + $0x68] sm:$0xff]  }
   0x3   :  { %v19_v7 = vmul.f32 10.0, %v15_v5  ;;  %v271_v8 = vld [vmem:[%s382_s1 + $0x78] sm:$0xff]   ;;  %v274_v13 = vld [vmem:[%s382_s1 + $0x30] sm:$0xff]   ;;  %v276_v15 = vld [vmem:[%s382_s1 + $0x28] sm:$0xff]  }
   0x4   :  { %v20_v9 = vmax.f32 %v16_v3, %v17_v4  ;;  %v272_v10 = vld [vmem:[%s382_s1 + $0x38] sm:$0xff]   ;;  %246 = vmatprep.subr.bf16.mxu0 %v271_v8  ;;  %v277_v16 = vld [vmem:[%s382_s1 + $0x60] sm:$0xff]   ;;  %v281_v20 = vld [vmem:[%s382_s1 + $0x50] sm:$0xff]  }
   0x5   :  { %v23_v12 = vmax.f32 %v18_v6, %v19_v7  ;;  %247 = vmatpush3.bf16.msra.mxu0 %v272_v10  ;;  %v278_v17 = vld [vmem:[%s382_s1 + $0x20] sm:$0xff]   ;;  %v279_v18 = vld [vmem:[%s382_s1 + $0x58] sm:$0xff]   ;;  %v282_v21 = vld [vmem:[%s382_s1 + $0x10] sm:$0xff]  }
   0x6   :  { %21 = vmax.xlane.f32.xlu0 %v20_v9  ;;  %248 = vmatprep.subr.bf16.mxu0 %v273_v11  ;;  %v280_v19 = vld [vmem:[%s382_s1 + $0x18] sm:$0xff]   ;;  %v283_v22 = vld [vmem:[%s382_s1 + $0x48] sm:$0xff]   ;;  %v285_v24 = vld [vmem:[%s382_s1 + $0x40] sm:$0xff]  }
   0x7   :  { %v284_v23 = vld [vmem:[%s382_s1 + $0x8] sm:$0xff]   ;;  %v286_v25 = vld [vmem:[%s382_s1] sm:$0xff]  }
   0x9   :  { %249 = vmatpush3.bf16.msra.mxu0 %v274_v13 }
   0xa   :  { %24 = vmax.xlane.f32.xlu0 %v23_v12  ;;  %250 = vmatprep.subr.bf16.mxu0 %v275_v14 }
   0xd   :  { %251 = vmatpush3.bf16.msra.mxu0 %v276_v15 }
   0xe   :  { %252 = vmatprep.subr.bf16.mxu0 %v277_v16 }
  0x11   :  { %253 = vmatpush3.bf16.msra.mxu0 %v278_v17 }
  0x12   :  { %254 = vmatprep.subr.bf16.mxu0 %v279_v18 }
  0x15   :  { %255 = vmatpush3.bf16.msra.mxu0 %v280_v19 }
  0x16   :  { %256 = vmatprep.subr.bf16.mxu0 %v281_v20 }
  0x19   :  { %257 = vmatpush3.bf16.msra.mxu0 %v282_v21 }
  0x1a   :  { %258 = vmatprep.subr.bf16.mxu0 %v283_v22 }
  0x1d   :  { %259 = vmatpush3.bf16.msra.mxu0 %v284_v23 }
  0x1e   :  { %260 = vmatprep.subr.bf16.mxu0 %v285_v24 }
  0x21   :  { %261 = vmatpush3.bf16.msra.mxu0 %v286_v25 }
  0x8f   :  { %v22_v26 = vpop.xlane.xlu0 %21 }
  0x90   :  { %v26_v27 = vsub.f32 %v16_v3, %v22_v26  ;;  %v27_v28 = vsub.f32 %v17_v4, %v22_v26 }
  0x92   :  { %v30_v29 = vmul.f32 1.442695, %v26_v27  ;;  %v32_v30 = vmul.f32 1.442695, %v27_v28 }
  0x93   :  { %v25_v31 = vpop.xlane.xlu0 %24 }
  0x94   :  { %v28_v32 = vsub.f32 %v18_v6, %v25_v31  ;;  %v29_v33 = vsub.f32 %v19_v7, %v25_v31  ;;  %287 = vpow2.f32 %v30_v29 }
  0x95   :  { %289 = vpow2.f32 %v32_v30 }
  0x96   :  { %v34_v34 = vmul.f32 1.442695, %v28_v32  ;;  %v36_v35 = vmul.f32 1.442695, %v29_v33 }
  0x98   :  { %291 = vpow2.f32 %v34_v34 }
  0x99   :  { %293 = vpow2.f32 %v36_v35 }
  0xa1   :  { %v288_v36 = vpop.eup %287 }
  0xa2   :  { %v290_v37 = vpop.eup %289 }
  0xa5   :  { %v292_v38 = vpop.eup %291 }
  0xa6   :  { %v294_v39 = vpop.eup %293  ;;  %v38_v40 = vpack.c.bf16 %v292_v38, %v288_v36 }
  0xa7   :  { %v39_v41 = vpack.c.bf16 %v294_v39, %v290_v37 }
  0xa9   :  { %200 = vmatprep.mubr.bf16.mxu0 %v39_v41 }
  0xaa   :  { %201 = vmatmul.mubr.bf16.vlgmr.msra.gmra.mxu0 %v38_v40 }
 0x16a   :  { %v262_v43 = vpop.f32.mrf.mxu0 }
 0x16c   :  { %v263_v44 = vpop.f32.mrf.mxu0 }
 0x16d   :  { %v264_v45 = vadd.f32 %v263_v44, %v262_v43 }
 0x16e   :  { %v265_v46 = vpop.f32.mrf.mxu0 }
 0x16f   :  { %295 = vrcp.f32 %v264_v45 }
 0x170   :  { %v266_v47 = vpop.f32.mrf.mxu0 }
 0x171   :  { %v267_v48 = vadd.f32 %v266_v47, %v265_v46 }
 0x173   :  { %297 = vrcp.f32 %v267_v48 }
 0x17c   :  { %v296_v49 = vpop.eup %295 }
 0x17d   :  { %213 = vperm.xlu1 %269, %v296_v49  }
 0x180   :  { %v298_v50 = vpop.eup %297 }
 0x181   :  { %218 = vperm.xlu1 %269, %v298_v50  }
 0x1f8   :  { %v214_v51 = vpop.permute.xlu1 %213 }
 0x1f9   :  { %v221_v52 = vmul.f32 %v264_v45, %v214_v51 }
 0x1fb   :  { %224 = vst.msk [vmem:[%s383_s2] sm:$0xff] %vm223_vm0, %v221_v52 }
 0x1fc   :  { %v219_v53 = vpop.permute.xlu1 %218 }
 0x1fd   :  { %v222_v54 = vmul.f32 %v267_v48, %v219_v53 }
 0x1ff   :  { %225 = vst.msk [vmem:[%s383_s2 + $0x8] sm:$0xff] %vm223_vm0, %v222_v54 }

</bundles_post_ra>
